<compile_context>
chip_gen: v6e
topology: v6e:2x2x1
jax: 0.10.0
libtpu: 0.0.40
codegen_flags: <defaults>
</compile_context>

<pallas_src>
from functools import partial

import jax
import jax.numpy as jnp
from jax.experimental import pallas as pl
from jax.experimental.pallas import tpu as pltpu


def mhca_kernel(m1_ref, m2_ref, wq_ref, bq_ref, wkvss_ref, bkvss_ref,
                wo_ref, bo_ref, out_ref, *scratch,
                num_heads, head_dim, h_pad, compute_dtype, n_s1_tiles):
    bb, ts1, din = m1_ref.shape
    _, s2, _ = m2_ref.shape
    cd = compute_dtype
    f32_path = jnp.dtype(cd) == jnp.dtype(jnp.float32)

    def split_heads(x, s):
        # (bb*s, >=num_heads*head_dim) -> (num_heads*bb, s, head_dim), head-major.
        x = x.astype(cd)
        parts = [x[:, h * head_dim:(h + 1) * head_dim].reshape(bb, s, head_dim)
                 for h in range(num_heads)]
        return jnp.concatenate(parts, axis=0)

    def kv_film():
        # K / V / FiLM-scale / FiLM-shift: ONE (M2, Din) @ (Din, 4*H_pad) matmul;
        # each segment is 128-lane aligned so the slices below are layout-free.
        m2 = m2_ref[...].reshape(bb * s2, din).astype(cd)
        kvss = jnp.dot(m2, wkvss_ref[...],
                       preferred_element_type=jnp.float32) + bkvss_ref[...]
        k = kvss[:, 0 * h_pad:1 * h_pad]
        v = kvss[:, 1 * h_pad:2 * h_pad]
        sc = kvss[:, 2 * h_pad:3 * h_pad]
        sh = kvss[:, 3 * h_pad:4 * h_pad]
        return k * sc + sh, v * sc + sh          # FiLM on the VPU, f32

    if n_s1_tiles > 1:
        # K/V are reused across S1 tiles: compute once per batch block into scratch.
        kf_ref, vf_ref = scratch

        @pl.when(pl.program_id(1) == 0)
        def _():
            kf, vf = kv_film()
            kf_ref[...] = kf.astype(cd)
            vf_ref[...] = vf.astype(cd)

        kh = split_heads(kf_ref[...], s2)
        vh = split_heads(vf_ref[...], s2)
    else:
        kf, vf = kv_film()
        kh = split_heads(kf, s2)
        vh = split_heads(vf, s2)

    # Q projection: one (M1, Din) @ (Din, H_pad) matmul, pre-scaled by 1/sqrt(hd).
    m1 = m1_ref[...].reshape(bb * ts1, din).astype(cd)
    q = jnp.dot(m1, wq_ref[...], preferred_element_type=jnp.float32) + bq_ref[...]
    q = q * (1.0 / (head_dim ** 0.5))
    qh = split_heads(q, ts1)

    # ---- attention as batched einsums (heads on the leading batch axis) ------
    scores = jnp.einsum("bqd,bkd->bqk", qh, kh,
                        preferred_element_type=jnp.float32)      # (nh*bb, ts1, s2)
    scores = scores - jnp.max(scores, axis=-1, keepdims=True)    # f32 max-subtract
    if f32_path:
        p = jnp.exp(scores)                                      # exact f32 path
    else:
        p = jnp.exp(scores.astype(cd))                           # bf16 EUP fast path
    denom = jnp.sum(p, axis=-1, keepdims=True, dtype=jnp.float32)

    # Unnormalized PV matmul; normalize afterwards (fewer elements than p).
    o = jnp.einsum("bqk,bkd->bqd", p.astype(cd), vh,
                   preferred_element_type=jnp.float32)           # (nh*bb, ts1, hd)
    if f32_path:
        o = o / denom                                            # exact divide
    else:
        o = o * pl.reciprocal(denom, approx=True)                # EUP slot

    # ---- output projection: sum_h O_h @ wo[h] in an f32 accumulator ----------
    acc = None
    for h in range(num_heads):
        oh = o[h * bb:(h + 1) * bb].reshape(bb * ts1, head_dim).astype(cd)
        c = jnp.dot(oh, wo_ref[h], preferred_element_type=jnp.float32)
        acc = c if acc is None else acc + c
    out = acc + bo_ref[...]
    out_ref[...] = out.reshape(bb, ts1, h_pad).astype(out_ref.dtype)


def _round_up(x, m):
    return ((x + m - 1) // m) * m


def _pad_last(a, size):
    cur = a.shape[-1]
    if cur == size:
        return a
    pad = [(0, 0)] * (a.ndim - 1) + [(0, size - cur)]
    return jnp.pad(a, pad)


def _has_two_tensorcores():
    # Best-effort detection of 2-TensorCore parts (v7x); fall back to single-TC.
    try:
        kind = jax.devices()[0].device_kind.lower()
    except Exception:
        return False
    return ("v7" in kind) or ("7x" in kind)


def _pick_block_b(batch, seq_q, seq_kv, two_tensorcores):
    """Batch rows per grid step: fill MXU rows; only reserve a second grid step
    for megacore sharding on 2-TensorCore parts. Keep reshapes trivial when the
    sequences are not 8-aligned."""
    if seq_q % 8 or seq_kv % 8:
        return 1
    bb = max(1, 256 // max(seq_q, seq_kv, 1))
    bb = min(bb, batch)
    if two_tensorcores and batch >= 2:
        bb = min(bb, max(1, batch // 2))
    bb = max(bb, 1)
    while batch % bb:
        bb -= 1
    return bb


def _pick_tile_s1(seq_q):
    if seq_q <= 256:
        return seq_q
    for t in (256, 128, 64, 32, 16, 8):
        if seq_q % t == 0:
            return t
    return seq_q


def multi_head_cross_modal_attention(mod1, mod2, params, num_heads,
                                     compute_dtype=jnp.bfloat16, block_b=None,
                                     tile_s1=None, out_dtype=None,
                                     two_tensorcores=None):
    B, S1, Din = mod1.shape
    B2, S2, Din2 = mod2.shape
    assert B2 == B and Din2 == Din
    H = params["wq"].shape[1]
    head_dim = H // num_heads
    assert head_dim * num_heads == H
    h_pad = _round_up(H, 128)                       # lane-dense output / segments

    if out_dtype is None:
        out_dtype = mod1.dtype                      # pass jnp.bfloat16 to halve writeback
    if two_tensorcores is None:
        two_tensorcores = _has_two_tensorcores()
    if block_b is None:
        block_b = _pick_block_b(B, S1, S2, two_tensorcores)
    assert B % block_b == 0
    if tile_s1 is None:
        tile_s1 = _pick_tile_s1(S1)
    assert S1 % tile_s1 == 0
    n_s1_tiles = S1 // tile_s1

    # ---- host-side weight fusion / padding / dtype casting -------------------
    w_dtype = compute_dtype
    wq = _pad_last(params["wq"], h_pad).astype(w_dtype)
    bq = _pad_last(params["bq"], h_pad)                                   # f32
    w_kvss = jnp.concatenate(
        [_pad_last(params[k], h_pad) for k in ("wk", "wv", "wsc", "wsh")],
        axis=1).astype(w_dtype)
    b_kvss = jnp.concatenate(
        [_pad_last(params[k], h_pad) for k in ("bk", "bv", "bsc", "bsh")], axis=1)
    wo = _pad_last(params["wo"], h_pad).reshape(
        num_heads, head_dim, h_pad).astype(w_dtype)
    bo = _pad_last(params["bo"], h_pad)                                   # f32

    kernel = partial(mhca_kernel, num_heads=num_heads, head_dim=head_dim,
                     h_pad=h_pad, compute_dtype=compute_dtype,
                     n_s1_tiles=n_s1_tiles)

    # Weights/biases: whole-array VMEM residents (one copy, no double buffering).
    wspec = pl.BlockSpec(memory_space=pltpu.MemorySpace.VMEM)
    in_specs = [
        pl.BlockSpec((block_b, tile_s1, Din), lambda b, t: (b, t, 0)),    # mod1
        pl.BlockSpec((block_b, S2, Din), lambda b, t: (b, 0, 0)),         # mod2
        wspec, wspec, wspec, wspec, wspec, wspec,
    ]
    out_spec = pl.BlockSpec((block_b, tile_s1, h_pad), lambda b, t: (b, t, 0))

    scratch_shapes = []
    if n_s1_tiles > 1:
        scratch_shapes = [pltpu.VMEM((block_b * S2, h_pad), compute_dtype),
                          pltpu.VMEM((block_b * S2, h_pad), compute_dtype)]

    # ---- explicit VMEM budget -------------------------------------------------
    act_isz = jnp.dtype(mod1.dtype).itemsize
    w_isz = jnp.dtype(w_dtype).itemsize
    cd_isz = jnp.dtype(compute_dtype).itemsize
    est = (2 * (block_b * tile_s1 * Din + block_b * S2 * Din) * act_isz         # act double buffers
           + 2 * block_b * tile_s1 * h_pad * jnp.dtype(out_dtype).itemsize      # out double buffer
           + (5 * Din * h_pad + H * h_pad) * w_isz + 6 * h_pad * 4              # weights + biases
           + (2 * block_b * S2 * h_pad * cd_isz if n_s1_tiles > 1 else 0)       # k/v scratch
           + (block_b * S2 * 4 * h_pad                                          # kvss
              + 2 * num_heads * block_b * tile_s1 * S2                          # scores + p
              + 3 * num_heads * block_b * max(tile_s1, S2) * head_dim           # qh/kh/vh
              + 2 * block_b * tile_s1 * h_pad) * 4)                             # o + out acc
    vmem_limit = int(min(64 << 20, max(32 << 20, 2 * est)))

    dim_sem = ("parallel", "arbitrary") if n_s1_tiles > 1 else ("parallel", "parallel")

    out = pl.pallas_call(
        kernel,
        out_shape=jax.ShapeDtypeStruct((B, S1, h_pad), out_dtype),
        grid_spec=pltpu.PrefetchScalarGridSpec(
            num_scalar_prefetch=0,
            grid=(B // block_b, n_s1_tiles),
            in_specs=in_specs,
            out_specs=out_spec,
            scratch_shapes=scratch_shapes),
        compiler_params=pltpu.CompilerParams(
            dimension_semantics=dim_sem,
            vmem_limit_bytes=vmem_limit),
    )(mod1, mod2, wq, bq, w_kvss, b_kvss, wo, bo)

    return out if h_pad == H else out[..., :H]


def reference(mod1, mod2, params, num_heads):
    """Pure-JAX reference mirroring the torch forward exactly."""
    B, S1, _ = mod1.shape
    H = params["wq"].shape[1]
    hd = H // num_heads

    def lin(x, w, b):
        return x @ w + b[0]

    def split_heads(x):  # (B, S, H) -> (B, nh, S, hd)
        B_, S_, _ = x.shape
        return x.reshape(B_, S_, num_heads, hd).transpose(0, 2, 1, 3)

    Q = split_heads(lin(mod1, params["wq"], params["bq"]))
    K = split_heads(lin(mod2, params["wk"], params["bk"]))
    V = split_heads(lin(mod2, params["wv"], params["bv"]))
    scale = split_heads(lin(mod2, params["wsc"], params["bsc"]))
    shift = split_heads(lin(mod2, params["wsh"], params["bsh"]))

    K = K * scale + shift
    V = V * scale + shift

    s = jnp.einsum("bhqd,bhkd->bhqk", Q, K) / (hd ** 0.5)
    p = jax.nn.softmax(s, axis=-1)
    o = jnp.einsum("bhqk,bhkd->bhqd", p, V)
    o = o.transpose(0, 2, 1, 3).reshape(B, S1, H)
    return lin(o, params["wo"], params["bo"])


def init_params(key, input_dim, hidden_dim):
    """Deterministic torch-Linear-style uniform init (weights stored transposed)."""
    names = ["q", "k", "v", "sc", "sh", "o"]
    in_dims = [input_dim] * 5 + [hidden_dim]
    params = {}
    keys = jax.random.split(key, 2 * len(names))
    for i, (n, din) in enumerate(zip(names, in_dims)):
        bound = 1.0 / (din ** 0.5)
        params["w" + n] = jax.random.uniform(
            keys[2 * i], (din, hidden_dim), jnp.float32, -bound, bound)
        params["b" + n] = jax.random.uniform(
            keys[2 * i + 1], (1, hidden_dim), jnp.float32, -bound, bound)
    return params


if __name__ == "__main__":
    B, S1, S2 = 2, 8, 8
    input_dim, hidden_dim, num_heads = 16, 32, 4

    key = jax.random.PRNGKey(0)
    k1, k2, k3 = jax.random.split(key, 3)
    mod1 = jax.random.normal(k1, (B, S1, input_dim), jnp.float32)
    mod2 = jax.random.normal(k2, (B, S2, input_dim), jnp.float32)
    params = init_params(k3, input_dim, hidden_dim)

    ref = reference(mod1, mod2, params, num_heads)

    # f32-on-MXU path: strict correctness gate (exact softmax divide on this path).
    out_f32 = jax.block_until_ready(
        multi_head_cross_modal_attention(mod1, mod2, params, num_heads,
                                         compute_dtype=jnp.float32))
    assert out_f32.shape == (B, S1, hidden_dim)
    assert jnp.allclose(out_f32, ref, atol=2e-3, rtol=2e-3), \
        f"f32 max abs err = {jnp.max(jnp.abs(out_f32 - ref))}"

    # bf16-on-MXU fast path (v6e/v7x), f32 accumulation: loose sanity check only.
    out_bf16 = jax.block_until_ready(
        multi_head_cross_modal_attention(mod1, mod2, params, num_heads,
                                         compute_dtype=jnp.bfloat16))
    assert out_bf16.shape == (B, S1, hidden_dim)
    assert jnp.allclose(out_bf16, ref, atol=1e-1, rtol=1e-1), \
        f"bf16 max abs err = {jnp.max(jnp.abs(out_bf16 - ref))}"

    # S1-tiled path (K/V cached in VMEM scratch across query tiles), f32, strict.
    S1_big = 16
    mod1_big = jax.random.normal(k1, (B, S1_big, input_dim), jnp.float32)
    ref_big = reference(mod1_big, mod2, params, num_heads)
    out_tiled = jax.block_until_ready(
        multi_head_cross_modal_attention(mod1_big, mod2, params, num_heads,
                                         compute_dtype=jnp.float32, tile_s1=8))
    assert out_tiled.shape == (B, S1_big, hidden_dim)
    assert jnp.allclose(out_tiled, ref_big, atol=2e-3, rtol=2e-3), \
        f"tiled max abs err = {jnp.max(jnp.abs(out_tiled - ref_big))}"

    print("KERNEL_OK")
</pallas_src>

<mosaic_0001>
module attributes {stable_mosaic.version = 11 : i64} {
  func.func @mhca_kernel(%arg0: i32, %arg1: i32, %arg2: memref<2x8x16xf32, #tpu.memory_space<vmem>>, %arg3: memref<2x8x16xf32, #tpu.memory_space<vmem>>, %arg4: memref<16x128xf32, #tpu.memory_space<vmem>>, %arg5: memref<1x128xf32, #tpu.memory_space<vmem>>, %arg6: memref<16x512xf32, #tpu.memory_space<vmem>>, %arg7: memref<1x512xf32, #tpu.memory_space<vmem>>, %arg8: memref<4x8x128xf32, #tpu.memory_space<vmem>>, %arg9: memref<1x128xf32, #tpu.memory_space<vmem>>, %arg10: memref<2x8x128xf32, #tpu.memory_space<vmem>>) attributes {dimension_semantics = [#tpu.dimension_semantics<parallel>, #tpu.dimension_semantics<parallel>], iteration_bounds = array<i64: 1, 1>, scalar_prefetch = 0 : i64, scratch_operands = 0 : i64, tpu.core_type = #tpu.core_type<tc>, window_params = [{transform_indices = @transform_0, window_bounds = array<i64: 2, 8, 16>}, {transform_indices = @transform_1, window_bounds = array<i64: 2, 8, 16>}, {pipeline_mode = #tpu.pipeline_mode<synchronous>, transform_indices = @transform_2, window_bounds = array<i64: 16, 128>}, {pipeline_mode = #tpu.pipeline_mode<synchronous>, transform_indices = @transform_3, window_bounds = array<i64: 1, 128>}, {pipeline_mode = #tpu.pipeline_mode<synchronous>, transform_indices = @transform_4, window_bounds = array<i64: 16, 512>}, {pipeline_mode = #tpu.pipeline_mode<synchronous>, transform_indices = @transform_5, window_bounds = array<i64: 1, 512>}, {pipeline_mode = #tpu.pipeline_mode<synchronous>, transform_indices = @transform_6, window_bounds = array<i64: 4, 8, 128>}, {pipeline_mode = #tpu.pipeline_mode<synchronous>, transform_indices = @transform_7, window_bounds = array<i64: 1, 128>}, {transform_indices = @transform_8, window_bounds = array<i64: 2, 8, 128>}]} {
    %c0 = arith.constant 0 : index
    %c0_0 = arith.constant 0 : index
    %c0_1 = arith.constant 0 : index
    %0 = vector.load %arg3[%c0, %c0_0, %c0_1] : memref<2x8x16xf32, #tpu.memory_space<vmem>>, vector<2x8x16xf32>
    %1 = vector.shape_cast %0 : vector<2x8x16xf32> to vector<16x16xf32>
    %c0_2 = arith.constant 0 : index
    %c0_3 = arith.constant 0 : index
    %2 = vector.load %arg6[%c0_2, %c0_3] : memref<16x512xf32, #tpu.memory_space<vmem>>, vector<16x512xf32>
    %cst = arith.constant dense<0.000000e+00> : vector<16x512xf32>
    %3 = tpu.matmul %1, %2, %cst {dimension_numbers = #tpu.dot_dimension_numbers<[1], [0], [0], [1], [0, 0, 1, 1], [], []>} : vector<16x16xf32>, vector<16x512xf32>, vector<16x512xf32> -> vector<16x512xf32>
    %c0_4 = arith.constant 0 : index
    %c0_5 = arith.constant 0 : index
    %4 = vector.load %arg7[%c0_4, %c0_5] : memref<1x512xf32, #tpu.memory_space<vmem>>, vector<1x512xf32>
    %5 = vector.broadcast %4 : vector<1x512xf32> to vector<16x512xf32>
    %6 = arith.addf %3, %5 : vector<16x512xf32>
    %7 = vector.extract_strided_slice %6 {offsets = [0, 0], sizes = [16, 128], strides = [1, 1]} : vector<16x512xf32> to vector<16x128xf32>
    %8 = vector.extract_strided_slice %6 {offsets = [0, 128], sizes = [16, 128], strides = [1, 1]} : vector<16x512xf32> to vector<16x128xf32>
    %9 = vector.extract_strided_slice %6 {offsets = [0, 256], sizes = [16, 128], strides = [1, 1]} : vector<16x512xf32> to vector<16x128xf32>
    %10 = vector.extract_strided_slice %6 {offsets = [0, 384], sizes = [16, 128], strides = [1, 1]} : vector<16x512xf32> to vector<16x128xf32>
    %11 = arith.mulf %7, %9 : vector<16x128xf32>
    %12 = arith.addf %11, %10 : vector<16x128xf32>
    %13 = arith.mulf %8, %9 : vector<16x128xf32>
    %14 = arith.addf %13, %10 : vector<16x128xf32>
    %15 = vector.extract_strided_slice %12 {offsets = [0, 0], sizes = [16, 8], strides = [1, 1]} : vector<16x128xf32> to vector<16x8xf32>
    %16 = vector.shape_cast %15 : vector<16x8xf32> to vector<2x8x8xf32>
    %17 = vector.extract_strided_slice %12 {offsets = [0, 8], sizes = [16, 8], strides = [1, 1]} : vector<16x128xf32> to vector<16x8xf32>
    %18 = vector.shape_cast %17 : vector<16x8xf32> to vector<2x8x8xf32>
    %19 = vector.extract_strided_slice %12 {offsets = [0, 16], sizes = [16, 8], strides = [1, 1]} : vector<16x128xf32> to vector<16x8xf32>
    %20 = vector.shape_cast %19 : vector<16x8xf32> to vector<2x8x8xf32>
    %21 = vector.extract_strided_slice %12 {offsets = [0, 24], sizes = [16, 8], strides = [1, 1]} : vector<16x128xf32> to vector<16x8xf32>
    %22 = vector.shape_cast %21 : vector<16x8xf32> to vector<2x8x8xf32>
    %23 = tpu.concatenate %16, %18, %20, %22 in 0 : vector<2x8x8xf32>, vector<2x8x8xf32>, vector<2x8x8xf32>, vector<2x8x8xf32> -> vector<8x8x8xf32>
    %24 = vector.extract_strided_slice %14 {offsets = [0, 0], sizes = [16, 8], strides = [1, 1]} : vector<16x128xf32> to vector<16x8xf32>
    %25 = vector.shape_cast %24 : vector<16x8xf32> to vector<2x8x8xf32>
    %26 = vector.extract_strided_slice %14 {offsets = [0, 8], sizes = [16, 8], strides = [1, 1]} : vector<16x128xf32> to vector<16x8xf32>
    %27 = vector.shape_cast %26 : vector<16x8xf32> to vector<2x8x8xf32>
    %28 = vector.extract_strided_slice %14 {offsets = [0, 16], sizes = [16, 8], strides = [1, 1]} : vector<16x128xf32> to vector<16x8xf32>
    %29 = vector.shape_cast %28 : vector<16x8xf32> to vector<2x8x8xf32>
    %30 = vector.extract_strided_slice %14 {offsets = [0, 24], sizes = [16, 8], strides = [1, 1]} : vector<16x128xf32> to vector<16x8xf32>
    %31 = vector.shape_cast %30 : vector<16x8xf32> to vector<2x8x8xf32>
    %32 = tpu.concatenate %25, %27, %29, %31 in 0 : vector<2x8x8xf32>, vector<2x8x8xf32>, vector<2x8x8xf32>, vector<2x8x8xf32> -> vector<8x8x8xf32>
    %c0_6 = arith.constant 0 : index
    %c0_7 = arith.constant 0 : index
    %c0_8 = arith.constant 0 : index
    %33 = vector.load %arg2[%c0_6, %c0_7, %c0_8] : memref<2x8x16xf32, #tpu.memory_space<vmem>>, vector<2x8x16xf32>
    %34 = vector.shape_cast %33 : vector<2x8x16xf32> to vector<16x16xf32>
    %c0_9 = arith.constant 0 : index
    %c0_10 = arith.constant 0 : index
    %35 = vector.load %arg4[%c0_9, %c0_10] : memref<16x128xf32, #tpu.memory_space<vmem>>, vector<16x128xf32>
    %cst_11 = arith.constant dense<0.000000e+00> : vector<16x128xf32>
    %36 = tpu.matmul %34, %35, %cst_11 {dimension_numbers = #tpu.dot_dimension_numbers<[1], [0], [0], [1], [0, 0, 1, 1], [], []>} : vector<16x16xf32>, vector<16x128xf32>, vector<16x128xf32> -> vector<16x128xf32>
    %c0_12 = arith.constant 0 : index
    %c0_13 = arith.constant 0 : index
    %37 = vector.load %arg5[%c0_12, %c0_13] : memref<1x128xf32, #tpu.memory_space<vmem>>, vector<1x128xf32>
    %38 = vector.broadcast %37 : vector<1x128xf32> to vector<16x128xf32>
    %39 = arith.addf %36, %38 : vector<16x128xf32>
    %cst_14 = arith.constant 0.353553385 : f32
    %40 = vector.broadcast %cst_14 : f32 to vector<16x128xf32>
    %41 = arith.mulf %39, %40 : vector<16x128xf32>
    %42 = vector.extract_strided_slice %41 {offsets = [0, 0], sizes = [16, 8], strides = [1, 1]} : vector<16x128xf32> to vector<16x8xf32>
    %43 = vector.shape_cast %42 : vector<16x8xf32> to vector<2x8x8xf32>
    %44 = vector.extract_strided_slice %41 {offsets = [0, 8], sizes = [16, 8], strides = [1, 1]} : vector<16x128xf32> to vector<16x8xf32>
    %45 = vector.shape_cast %44 : vector<16x8xf32> to vector<2x8x8xf32>
    %46 = vector.extract_strided_slice %41 {offsets = [0, 16], sizes = [16, 8], strides = [1, 1]} : vector<16x128xf32> to vector<16x8xf32>
    %47 = vector.shape_cast %46 : vector<16x8xf32> to vector<2x8x8xf32>
    %48 = vector.extract_strided_slice %41 {offsets = [0, 24], sizes = [16, 8], strides = [1, 1]} : vector<16x128xf32> to vector<16x8xf32>
    %49 = vector.shape_cast %48 : vector<16x8xf32> to vector<2x8x8xf32>
    %50 = tpu.concatenate %43, %45, %47, %49 in 0 : vector<2x8x8xf32>, vector<2x8x8xf32>, vector<2x8x8xf32>, vector<2x8x8xf32> -> vector<8x8x8xf32>
    "tpu.trace_start"() <{level = 10 : i32, message = "bqd,bkd->bqk"}> : () -> ()
    %cst_15 = arith.constant dense<0.000000e+00> : vector<8x8x8xf32>
    %51 = tpu.matmul %50, %23, %cst_15 {dimension_numbers = #tpu.dot_dimension_numbers<[2], [2], [1], [1], [0, 0, 0, 1, 1, 1], [0], [0]>} : vector<8x8x8xf32>, vector<8x8x8xf32>, vector<8x8x8xf32> -> vector<8x8x8xf32>
    "tpu.trace_stop"() : () -> ()
    %cst_16 = arith.constant dense<0xFF800000> : vector<8x8xf32>
    %52 = vector.multi_reduction <maximumf>, %51, %cst_16 [2] : vector<8x8x8xf32> to vector<8x8xf32>
    %53 = vector.shape_cast %52 : vector<8x8xf32> to vector<8x8x1xf32>
    %54 = vector.broadcast %53 : vector<8x8x1xf32> to vector<8x8x8xf32>
    %55 = arith.subf %51, %54 : vector<8x8x8xf32>
    %56 = math.exp %55 : vector<8x8x8xf32>
    %cst_17 = arith.constant dense<0.000000e+00> : vector<8x8xf32>
    %57 = vector.multi_reduction <add>, %56, %cst_17 [2] : vector<8x8x8xf32> to vector<8x8xf32>
    %58 = vector.shape_cast %57 : vector<8x8xf32> to vector<8x8x1xf32>
    "tpu.trace_start"() <{level = 10 : i32, message = "bqk,bkd->bqd"}> : () -> ()
    %cst_18 = arith.constant dense<0.000000e+00> : vector<8x8x8xf32>
    %59 = tpu.matmul %56, %32, %cst_18 {dimension_numbers = #tpu.dot_dimension_numbers<[2], [1], [1], [2], [0, 0, 0, 1, 1, 2], [0], [0]>} : vector<8x8x8xf32>, vector<8x8x8xf32>, vector<8x8x8xf32> -> vector<8x8x8xf32>
    "tpu.trace_stop"() : () -> ()
    %60 = vector.broadcast %58 : vector<8x8x1xf32> to vector<8x8x8xf32>
    %61 = arith.divf %59, %60 : vector<8x8x8xf32>
    %62 = vector.extract_strided_slice %61 {offsets = [0, 0, 0], sizes = [2, 8, 8], strides = [1, 1, 1]} : vector<8x8x8xf32> to vector<2x8x8xf32>
    %63 = vector.shape_cast %62 : vector<2x8x8xf32> to vector<16x8xf32>
    %c0_19 = arith.constant 0 : index
    %c0_20 = arith.constant 0 : index
    %c0_21 = arith.constant 0 : index
    %64 = vector.load %arg8[%c0_19, %c0_20, %c0_21] : memref<4x8x128xf32, #tpu.memory_space<vmem>>, vector<1x8x128xf32>
    %65 = vector.shape_cast %64 : vector<1x8x128xf32> to vector<8x128xf32>
    %cst_22 = arith.constant dense<0.000000e+00> : vector<16x128xf32>
    %66 = tpu.matmul %63, %65, %cst_22 {dimension_numbers = #tpu.dot_dimension_numbers<[1], [0], [0], [1], [0, 0, 1, 1], [], []>} : vector<16x8xf32>, vector<8x128xf32>, vector<16x128xf32> -> vector<16x128xf32>
    %67 = vector.extract_strided_slice %61 {offsets = [2, 0, 0], sizes = [2, 8, 8], strides = [1, 1, 1]} : vector<8x8x8xf32> to vector<2x8x8xf32>
    %68 = vector.shape_cast %67 : vector<2x8x8xf32> to vector<16x8xf32>
    %c1 = arith.constant 1 : index
    %c0_23 = arith.constant 0 : index
    %c0_24 = arith.constant 0 : index
    %69 = vector.load %arg8[%c1, %c0_23, %c0_24] : memref<4x8x128xf32, #tpu.memory_space<vmem>>, vector<1x8x128xf32>
    %70 = vector.shape_cast %69 : vector<1x8x128xf32> to vector<8x128xf32>
    %cst_25 = arith.constant dense<0.000000e+00> : vector<16x128xf32>
    %71 = tpu.matmul %68, %70, %cst_25 {dimension_numbers = #tpu.dot_dimension_numbers<[1], [0], [0], [1], [0, 0, 1, 1], [], []>} : vector<16x8xf32>, vector<8x128xf32>, vector<16x128xf32> -> vector<16x128xf32>
    %72 = arith.addf %66, %71 : vector<16x128xf32>
    %73 = vector.extract_strided_slice %61 {offsets = [4, 0, 0], sizes = [2, 8, 8], strides = [1, 1, 1]} : vector<8x8x8xf32> to vector<2x8x8xf32>
    %74 = vector.shape_cast %73 : vector<2x8x8xf32> to vector<16x8xf32>
    %c2 = arith.constant 2 : index
    %c0_26 = arith.constant 0 : index
    %c0_27 = arith.constant 0 : index
    %75 = vector.load %arg8[%c2, %c0_26, %c0_27] : memref<4x8x128xf32, #tpu.memory_space<vmem>>, vector<1x8x128xf32>
    %76 = vector.shape_cast %75 : vector<1x8x128xf32> to vector<8x128xf32>
    %cst_28 = arith.constant dense<0.000000e+00> : vector<16x128xf32>
    %77 = tpu.matmul %74, %76, %cst_28 {dimension_numbers = #tpu.dot_dimension_numbers<[1], [0], [0], [1], [0, 0, 1, 1], [], []>} : vector<16x8xf32>, vector<8x128xf32>, vector<16x128xf32> -> vector<16x128xf32>
    %78 = arith.addf %72, %77 : vector<16x128xf32>
    %79 = vector.extract_strided_slice %61 {offsets = [6, 0, 0], sizes = [2, 8, 8], strides = [1, 1, 1]} : vector<8x8x8xf32> to vector<2x8x8xf32>
    %80 = vector.shape_cast %79 : vector<2x8x8xf32> to vector<16x8xf32>
    %c3 = arith.constant 3 : index
    %c0_29 = arith.constant 0 : index
    %c0_30 = arith.constant 0 : index
    %81 = vector.load %arg8[%c3, %c0_29, %c0_30] : memref<4x8x128xf32, #tpu.memory_space<vmem>>, vector<1x8x128xf32>
    %82 = vector.shape_cast %81 : vector<1x8x128xf32> to vector<8x128xf32>
    %cst_31 = arith.constant dense<0.000000e+00> : vector<16x128xf32>
    %83 = tpu.matmul %80, %82, %cst_31 {dimension_numbers = #tpu.dot_dimension_numbers<[1], [0], [0], [1], [0, 0, 1, 1], [], []>} : vector<16x8xf32>, vector<8x128xf32>, vector<16x128xf32> -> vector<16x128xf32>
    %84 = arith.addf %78, %83 : vector<16x128xf32>
    %c0_32 = arith.constant 0 : index
    %c0_33 = arith.constant 0 : index
    %85 = vector.load %arg9[%c0_32, %c0_33] : memref<1x128xf32, #tpu.memory_space<vmem>>, vector<1x128xf32>
    %86 = vector.broadcast %85 : vector<1x128xf32> to vector<16x128xf32>
    %87 = arith.addf %84, %86 : vector<16x128xf32>
    %88 = vector.shape_cast %87 : vector<16x128xf32> to vector<2x8x128xf32>
    %c0_34 = arith.constant 0 : index
    %c0_35 = arith.constant 0 : index
    %c0_36 = arith.constant 0 : index
    %89 = vector.load %arg10[%c0_34, %c0_35, %c0_36] : memref<2x8x128xf32, #tpu.memory_space<vmem>>, vector<2x8x128xf32>
    tpu.vector_store %arg10[%c0_34, %c0_35, %c0_36], %88 {strides = array<i32>} : memref<2x8x128xf32, #tpu.memory_space<vmem>>, vector<2x8x128xf32>,
    return
  }
  func.func @transform_0(%arg0: i32, %arg1: i32) -> (i32, i32, i32) {
    %c0_i32 = arith.constant 0 : i32
    %c0_i32_0 = arith.constant 0 : i32
    return %arg0, %arg1, %c0_i32 : i32, i32, i32
  }
  func.func @transform_1(%arg0: i32, %arg1: i32) -> (i32, i32, i32) {
    %c0_i32 = arith.constant 0 : i32
    %c0_i32_0 = arith.constant 0 : i32
    %c0_i32_1 = arith.constant 0 : i32
    return %arg0, %c0_i32, %c0_i32_0 : i32, i32, i32
  }
  func.func @transform_2(%arg0: i32, %arg1: i32) -> (i32, i32) {
    %c0_i32 = arith.constant 0 : i32
    %c0_i32_0 = arith.constant 0 : i32
    %c0_i32_1 = arith.constant 0 : i32
    return %c0_i32, %c0_i32_0 : i32, i32
  }
  func.func @transform_3(%arg0: i32, %arg1: i32) -> (i32, i32) {
    %c0_i32 = arith.constant 0 : i32
    %c0_i32_0 = arith.constant 0 : i32
    %c0_i32_1 = arith.constant 0 : i32
    return %c0_i32, %c0_i32_0 : i32, i32
  }
  func.func @transform_4(%arg0: i32, %arg1: i32) -> (i32, i32) {
    %c0_i32 = arith.constant 0 : i32
    %c0_i32_0 = arith.constant 0 : i32
    %c0_i32_1 = arith.constant 0 : i32
    return %c0_i32, %c0_i32_0 : i32, i32
  }
  func.func @transform_5(%arg0: i32, %arg1: i32) -> (i32, i32) {
    %c0_i32 = arith.constant 0 : i32
    %c0_i32_0 = arith.constant 0 : i32
    %c0_i32_1 = arith.constant 0 : i32
    return %c0_i32, %c0_i32_0 : i32, i32
  }
  func.func @transform_6(%arg0: i32, %arg1: i32) -> (i32, i32, i32) {
    %c0_i32 = arith.constant 0 : i32
    %c0_i32_0 = arith.constant 0 : i32
    %c0_i32_1 = arith.constant 0 : i32
    %c0_i32_2 = arith.constant 0 : i32
    return %c0_i32, %c0_i32_0, %c0_i32_1 : i32, i32, i32
  }
  func.func @transform_7(%arg0: i32, %arg1: i32) -> (i32, i32) {
    %c0_i32 = arith.constant 0 : i32
    %c0_i32_0 = arith.constant 0 : i32
    %c0_i32_1 = arith.constant 0 : i32
    return %c0_i32, %c0_i32_0 : i32, i32
  }
  func.func @transform_8(%arg0: i32, %arg1: i32) -> (i32, i32, i32) {
    %c0_i32 = arith.constant 0 : i32
    %c0_i32_0 = arith.constant 0 : i32
    return %arg0, %arg1, %c0_i32 : i32, i32, i32
  }
}

</mosaic_0001>

<bundles_post_ra>
// kernel: tpu_custom_call.1
= control target key start
LH: loop header
LB: loop body
LE: loop exit
PB: predicated region body
PF: predicated region fallthrough
CT: control target
= control target key end

     0   :  { %13 = vsyncpa [#allocation3], 0  ;;  %s2682_s0 = inlined_call_operand.hbm [shape: f32[2,8,16], index: 0, kind: input, shape index: {}]   ;;  %s2683_s1 = inlined_call_operand.hbm [shape: f32[2,8,16], index: 1, kind: input, shape index: {}]   ;;  %s2684_s2 = inlined_call_operand.hbm [shape: f32[16,128], index: 2, kind: input, shape index: {}]   ;;  %s2685_s3 = inlined_call_operand.vmem [shape: f32[1,128], index: 3, kind: input, shape index: {}]   ;;  %s2686_s4 = inlined_call_operand.hbm [shape: f32[16,512], index: 4, kind: input, shape index: {}]   ;;  %s2687_s5 = inlined_call_operand.vmem [shape: f32[1,512], index: 5, kind: input, shape index: {}]   ;;  %s2688_s6 = inlined_call_operand.hbm [shape: f32[4,8,128], index: 6, kind: input, shape index: {}]   ;;  %s2689_s7 = inlined_call_operand.vmem [shape: f32[1,128], index: 7, kind: input, shape index: {}]   ;;  %s2690_s8 = inlined_call_operand.hbm [shape: f32[2,8,128], index: 8, kind: output, shape index: {}]  }
   0x1   :  { %14 = vsyncpa [#allocation6], 0 }
   0x2   :  { %15 = vsyncpa [#allocation9], 0 }
   0x3   :  { %16 = vsyncpa [#allocation4], 0  ;;  %s2441_s27 = smov [#allocation5]   ;;  %s2442_s29 = smov [#allocation8]  }
   0x4   :  { %s34_s28 = sshll.u32 %s2441_s27, 4  ;;  %s60_s30 = sshll.u32 %s2442_s29, 4  ;;  %s35_s28 = int_to_ptr.vmem [resolvable:$true] %s34_s28  ;;  %s61_s30 = int_to_ptr.vmem [resolvable:$true] %s60_s30 }
   0x5   :  { %s2321_s9 = scalar_lea.vmem %s35_s28, 256  ;;  %p2326_p1 = scmp.lt.s32.totalorder %s35_s28, %s35_s28 }
   0x6   :  { %p2322_p0 = scmp.ne.s32.totalorder %s35_s28, %s2321_s9  ;;  %p2327_p2 = scmp.lt.s32.totalorder %s2321_s9, %s2321_s9 }
   0x8   :  { %p2328_p3 = por %p2327_p2, %p2326_p1 }
   0xa   :  { %p2329_p4 = pnand %p2328_p3, %p2322_p0 }
   0xc   :  { %2332 = shalt.err (!%p2329_p4)
}
   0xd   :  { %s2443_s10 = smov 128   ;;  %s2444_s11 = smov 8  }
   0xe   :  { %40 = dma.hbm_to_vmem [thread:$0]  %s2683_s1, 256, %s35_s28, [#allocation6], %s2443_s10, %s2443_s10, %s2444_s11  }
   0xf   :  { %s2341_s14 = scalar_lea.vmem %s61_s30, 1024  ;;  %p2346_p6 = scmp.lt.s32.totalorder %s61_s30, %s61_s30 }
  0x10   :  { %p2342_p5 = scmp.ne.s32.totalorder %s61_s30, %s2341_s14  ;;  %p2347_p7 = scmp.lt.s32.totalorder %s2341_s14, %s2341_s14 }
  0x12   :  { %p2348_p8 = por %p2347_p7, %p2346_p6 }
  0x14   :  { %p2349_p9 = pnand %p2348_p8, %p2342_p5 }
  0x16   :  { %2352 = shalt.err (!%p2349_p9)
}
  0x17   :  { %s2445_s15 = smov 512   ;;  %s2446_s16 = smov 32  }
  0x18   :  { %66 = dma.hbm_to_vmem [thread:$0]  %s2686_s4, 1024, %s61_s30, [#allocation9], %s2445_s15, %s2445_s15, %s2446_s16  }
  0x19   :  { %s2447_s19 = smov [#allocation2]   ;;  %s2448_s21 = smov [#allocation7]  }
  0x1a   :  { %s22_s20 = sshll.u32 %s2447_s19, 4  ;;  %s46_s22 = sshll.u32 %s2448_s21, 4  ;;  %s23_s20 = int_to_ptr.vmem [resolvable:$true] %s22_s20  ;;  %s47_s22 = int_to_ptr.vmem [resolvable:$true] %s46_s22 }
  0x1b   :  { %s2361_s1 = scalar_lea.vmem %s23_s20, 256  ;;  %p2366_p11 = scmp.lt.s32.totalorder %s23_s20, %s23_s20 }
  0x1c   :  { %p2362_p10 = scmp.ne.s32.totalorder %s23_s20, %s2361_s1  ;;  %p2367_p12 = scmp.lt.s32.totalorder %s2361_s1, %s2361_s1 }
  0x1e   :  { %p2368_p13 = por %p2367_p12, %p2366_p11 }
  0x20   :  { %p2369_p0 = pnand %p2368_p13, %p2362_p10 }
  0x22   :  { %2372 = shalt.err (!%p2369_p0)
}
  0x23   :  { %28 = dma.hbm_to_vmem [thread:$0]  %s2682_s0, 256, %s23_s20, [#allocation3], %s2443_s10, %s2443_s10, %s2444_s11  }
  0x24   :  { %s2381_s4 = scalar_lea.vmem %s47_s22, 256  ;;  %p2386_p2 = scmp.lt.s32.totalorder %s47_s22, %s47_s22 }
  0x25   :  { %p2382_p1 = scmp.ne.s32.totalorder %s47_s22, %s2381_s4  ;;  %p2387_p3 = scmp.lt.s32.totalorder %s2381_s4, %s2381_s4 }
  0x27   :  { %p2388_p4 = por %p2387_p3, %p2386_p2 }
  0x29   :  { %p2389_p5 = pnand %p2388_p4, %p2382_p1 }
  0x2b   :  { %2392 = shalt.err (!%p2389_p5)
}
  0x2c   :  { %52 = dma.hbm_to_vmem [thread:$0]  %s2684_s2, 256, %s47_s22, [#allocation6], %s2443_s10, %s2443_s10, %s2444_s11  }
  0x2d   :  { %s2449_s27 = smov [#allocation10]  }
  0x2e   :  { %s74_s28 = sshll.u32 %s2449_s27, 4  ;;  %s75_s28 = int_to_ptr.vmem [resolvable:$true] %s74_s28 }
  0x2f   :  { %s2401_s29 = scalar_lea.vmem %s75_s28, 512  ;;  %p2406_p7 = scmp.lt.s32.totalorder %s75_s28, %s75_s28 }
  0x30   :  { %p2402_p6 = scmp.ne.s32.totalorder %s75_s28, %s2401_s29  ;;  %p2407_p8 = scmp.lt.s32.totalorder %s2401_s29, %s2401_s29 }
  0x32   :  { %p2408_p9 = por %p2407_p8, %p2406_p7 }
  0x34   :  { %p2409_p10 = pnand %p2408_p9, %p2402_p6 }
  0x36   :  { %2412 = shalt.err (!%p2409_p10)
}
  0x37   :  { %80 = dma.hbm_to_vmem [thread:$0]  %s2688_s6, 512, %s75_s28, [#allocation9], %s2443_s10, %s2443_s10, %s2444_s11  }
  0x38   :  { %2433 = dma.done.wait [#allocation3], 256  }
  0x39   :  { %2434 = vsyncadd [#allocation3], 4294967040 }
  0x3a   :  { %2435 = dma.done.wait [#allocation6], 512  }
  0x3b   :  { %2436 = vsyncadd [#allocation6], 4294966784 }
  0x3c   :  { %2437 = dma.done.wait [#allocation9], 1536  }
  0x3d   :  { %2438 = vsyncadd [#allocation9], 4294965760  ;;  %v2450_v0 = vmov 0.0   ;;  %v105_v1 = vld [vmem:[#allocation8 + $0x28] sm:$0xff]  ;;  %v107_v2 = vld [vmem:[#allocation8 + $0x38] sm:$0xff]  ;;  %vm130_vm0 = vcmask 130048   ;;  %v110_v15 = vlaneseq }
  0x3e   :  { %201 = vmatprep.mubr.f32.mxu0 %v2450_v0  ;;  %278 = vmatprep.mubr.f32.mxu1 %v2450_v0  ;;  %v104_v3 = vld [vmem:[#allocation8 + $0x20] sm:$0xff]  ;;  %v106_v4 = vld [vmem:[#allocation8 + $0x30] sm:$0xff]  ;;  %v101_v5 = vld [vmem:[#allocation8 + $0x8] sm:$0xff]  ;;  %vm2451_vm1 = vmmov 0   ;;  %vm441_vm2 = vcmask 64512   ;;  %s2452_s12 = smov 112  }
  0x3f   :  { %165 = vmatprep.subr.mxu0 %v105_v1  ;;  %242 = vmatprep.subr.mxu1 %v107_v2  ;;  %v103_v6 = vld [vmem:[#allocation8 + $0x18] sm:$0xff]  ;;  %v100_v7 = vld [vmem:[#allocation8] sm:$0xff]  ;;  %v102_v8 = vld [vmem:[#allocation8 + $0x10] sm:$0xff]  ;;  %v111_v16 = vshrl.u32 %v110_v15, 7  ;;  %s2453_s13 = smov 120   ;;  %s2455_s16 = smov [#allocation11]  }
  0x40   :  { %166 = vmatpush1.msra.mxu0 %v104_v3  ;;  %243 = vmatpush1.msra.mxu1 %v106_v4  ;;  %v98_v9 = vld [vmem:[#allocation5] sm:$0xff]  ;;  %v336_v10 = vld [vmem:[#allocation7 + $0x8] sm:$0xff]  ;;  %v335_v11 = vld [vmem:[#allocation7] sm:$0xff]  ;;  %s2057_s17 = sshll.u32 %s2455_s16, 4  ;;  %s2058_s17 = int_to_ptr.vmem [resolvable:$true] %s2057_s17 }
  0x41   :  { %167 = vmatprep.subr.mxu0 %v101_v5  ;;  %244 = vmatprep.subr.mxu1 %v103_v6  ;;  %v99_v12 = vld [vmem:[#allocation5 + $0x8] sm:$0xff]  ;;  %v333_v13 = vld [vmem:[#allocation2] sm:$0xff]  ;;  %v334_v14 = vld [vmem:[#allocation2 + $0x8] sm:$0xff]  ;;  %v112_v17 = vsub.s32 0, %v111_v16  ;;  %v120_v18 = vsub.s32 2, %v111_v16  ;;  %v124_v20 = vsub.s32 3, %v111_v16  ;;  %p2418_p12 = scmp.lt.s32.totalorder %s2058_s17, %s2058_s17 }
  0x42   :  { %168 = vmatpush1.msra.mxu0 %v100_v7  ;;  %245 = vmatpush1.msra.mxu1 %v102_v8  ;;  %v108_v19 = vld [vmem:[%s2687_s5] sm:$0xf]  ;;  %v116_v48 = vsub.s32 1, %v111_v16  ;;  %s2413_s18 = scalar_lea.vmem %s2058_s17, 256 }
  0x43   :  { %2071 = vmatmul.mubr.msk.f32.vlgmr.msra.gmra.mxu0 %vm130_vm0, %v98_v9  ;;  %2073 = vmatmul.mubr.msk.f32.vlgmr.msra.gmra.mxu1 %vm130_vm0, %v98_v9  ;;  %v113_v21 = vrot.slane %v108_v19, %v112_v17  ;;  %v121_v22 = vrot.slane %v108_v19, %v120_v18  ;;  %v125_v23 = vrot.slane %v108_v19, %v124_v20  ;;  %v2075_v39 = vld [vmem:[%s2685_s3] ss:$0 sm:$0xff]  ;;  %s2454_s3 = smov 104   ;;  %p2414_p11 = scmp.ne.s32.totalorder %s2058_s17, %s2413_s18 }
  0x44   :  { %2159 = vmatprep.subr.mxu0 %v336_v10  ;;  %207 = vmatprep.mubr.f32.mxu0 %v2450_v0  ;;  %v117_v50 = vrot.slane %v108_v19, %v116_v48  ;;  %p2419_p13 = scmp.lt.s32.totalorder %s2413_s18, %s2413_s18 }
  0x45   :  { %2160 = vmatpush3.msra.mxu0 %v336_v10  ;;  %284 = vmatprep.mubr.f32.mxu1 %v2450_v0 }
  0x46   :  { %2161 = vmatprep.subr.mxu0 %v335_v11  ;;  %2166 = vmatprep.subr.mxu1 %v2450_v0  ;;  %p2420_p0 = por %p2419_p13, %p2418_p12 }
  0x47   :  { %2072 = vmatmul.mubr.msk.f32.gmra.mxu0 %vm130_vm0, %v99_v12  ;;  %2074 = vmatmul.mubr.msk.f32.gmra.mxu1 %vm130_vm0, %v99_v12 }
  0x48   :  { %2162 = vmatpush3.msra.mxu0 %v335_v11  ;;  %2163 = vmatprep.mubr.msk.f32.mxu0 %vm130_vm0, %v333_v13  ;;  %p2421_p1 = pnand %p2420_p0, %p2414_p11 }
  0x49   :  { %2171 = vmatprep.subr.mxu0 %v2450_v0  ;;  %2168 = vmatprep.mubr.msk.f32.mxu1 %vm2451_vm1, %v2450_v0 }
  0x4b   :  { %2164 = vmatmul.mubr.msk.f32.vlgmr.msra.gmra.mxu0 %vm130_vm0, %v334_v14 }
  0x4c   :  { %2173 = vmatprep.mubr.msk.f32.mxu0 %vm2451_vm1, %v2450_v0 }
 0x103   :  { %v203_v24 = vpop.f32.mrf.mxu0  ;;  %v280_v25 = vpop.f32.mrf.mxu1 }
 0x104   :  { %v204_v26 = vadd.f32 %v203_v24, %v113_v21  ;;  %v281_v27 = vadd.f32 %v280_v25, %v121_v22 }
 0x105   :  { %v205_v28 = vpop.f32.mrf.mxu0  ;;  %v282_v29 = vpop.f32.mrf.mxu1 }
 0x106   :  { %v291_v30 = vmul.f32 %v281_v27, %v204_v26  ;;  %v283_v31 = vadd.f32 %v282_v29, %v125_v23  ;;  %v206_v51 = vadd.f32 %v205_v28, %v117_v50 }
 0x107   :  { %v209_v32 = vpop.f32.mrf.mxu0  ;;  %v286_v33 = vpop.f32.mrf.mxu1 }
 0x108   :  { %v293_v34 = vadd.f32 %v291_v30, %v283_v31  ;;  %v210_v35 = vadd.f32 %v209_v32, %v113_v21  ;;  %v287_v36 = vadd.f32 %v286_v33, %v121_v22  ;;  %v295_v53 = vmul.f32 %v281_v27, %v206_v51 }
 0x109   :  { %v211_v37 = vpop.f32.mrf.mxu0  ;;  %v288_v38 = vpop.f32.mrf.mxu1 }
 0x10a   :  { %v292_v40 = vmul.f32 %v287_v36, %v210_v35  ;;  %v289_v41 = vadd.f32 %v288_v38, %v125_v23  ;;  %305 = vrot.lane.b32.xlu1 %v293_v34, %s2452_s12  ;;  %301 = vrot.lane.b32.xlu0 %v293_v34, %s2453_s13  ;;  %v212_v52 = vadd.f32 %v211_v37, %v117_v50 }
 0x10b   :  { %2167 = vmatpush3.xpose.msk.msra.mxu1 %vm441_vm2, %v293_v34  ;;  %v2165_v42 = vpop.f32.mrf.mxu0  ;;  %v2572_v55 = vadd.f32 %v295_v53, %v283_v31 }
 0x10c   :  { %v294_v43 = vadd.f32 %v292_v40, %v289_v41  ;;  %v422_v44 = vadd.f32 %v2165_v42, %v2075_v39  ;;  %2176 = vmatprep.subr.mxu1 %v2450_v0  ;;  %v296_v54 = vmul.f32 %v287_v36, %v212_v52 }
 0x10d   :  { %v416_v45 = vpop.f32.mrf.mxu0 }
 0x10e   :  { %v426_v46 = vmul.f32 0.35355338, %v422_v44  ;;  %v417_v47 = vadd.f32 %v2075_v39, %v416_v45  ;;  %2172 = vmatpush3.xpose.msk.msra.mxu0 %vm441_vm2, %v294_v43  ;;  %307 = vrot.lane.b32.xlu1 %v294_v43, %s2452_s12  ;;  %v2574_v56 = vadd.f32 %v296_v54, %v289_v41 }
 0x10f   :  { %303 = vrot.lane.b32.xlu0 %v294_v43, %s2453_s13  ;;  %2181 = vmatprep.subr.mxu0 %v2450_v0 }
 0x110   :  { %v425_v49 = vmul.f32 0.35355338, %v417_v47 }
 0x111   :  { %2174 = vmatmul.mubr.msk.f32.vlgmr.msra.gmra.mxu0 %vm441_vm2, %v426_v46 }
 0x112   :  { %429 = vrot.lane.b32.xlu1 %v425_v49, %s2453_s13  ;;  %2169 = vmatmul.mubr.msk.f32.vlgmr.msra.gmra.mxu1 %vm441_vm2, %v425_v49 }
 0x113   :  { %431 = vrot.lane.b32.xlu0 %v426_v46, %s2453_s13  ;;  %2183 = vmatprep.mubr.msk.f32.mxu0 %vm2451_vm1, %v2450_v0 }
 0x114   :  { %2178 = vmatprep.mubr.msk.f32.mxu1 %vm2451_vm1, %v2450_v0 }
 0x116   :  { %309 = vrot.lane.b32.xlu1 %v293_v34, %s2454_s3 }
 0x117   :  { %435 = vrot.lane.b32.xlu0 %v426_v46, %s2452_s12 }
 0x11a   :  { %311 = vrot.lane.b32.xlu1 %v294_v43, %s2454_s3 }
 0x11b   :  { %433 = vrot.lane.b32.xlu0 %v425_v49, %s2452_s12 }
 0x11e   :  { %439 = vrot.lane.b32.xlu1 %v426_v46, %s2454_s3 }
 0x11f   :  { %437 = vrot.lane.b32.xlu0 %v425_v49, %s2454_s3 }
 0x122   :  { %315 = vrot.lane.b32.xlu1 %v2572_v55, %s2453_s13 }
 0x123   :  { %317 = vrot.lane.b32.xlu0 %v2574_v56, %s2453_s13 }
 0x126   :  { %321 = vrot.lane.b32.xlu1 %v2572_v55, %s2452_s12 }
 0x12a   :  { %323 = vrot.lane.b32.xlu1 %v2574_v56, %s2452_s12 }
 0x17c   :  { %v306_v57 = vpop.permute.xlu1 %305  ;;  %v302_v58 = vpop.permute.xlu0 %301 }
 0x17d   :  { %2177 = vmatpush3.xpose.msk.msra.mxu1 %vm441_vm2, %v302_v58 }
 0x17e   :  { %2186 = vmatprep.subr.mxu1 %v2450_v0 }
 0x180   :  { %v308_v59 = vpop.permute.xlu1 %307 }
 0x181   :  { %v304_v60 = vpop.permute.xlu0 %303 }
 0x182   :  { %2182 = vmatpush3.xpose.msk.msra.mxu0 %vm441_vm2, %v304_v60 }
 0x183   :  { %2191 = vmatprep.subr.mxu0 %v2450_v0 }
 0x184   :  { %v430_v61 = vpop.permute.xlu1 %429 }
 0x185   :  { %v432_v62 = vpop.permute.xlu0 %431  ;;  %2179 = vmatmul.mubr.msk.f32.vlgmr.msra.gmra.mxu1 %vm441_vm2, %v430_v61 }
 0x186   :  { %2184 = vmatmul.mubr.msk.f32.vlgmr.msra.gmra.mxu0 %vm441_vm2, %v432_v62  ;;  %2187 = vmatpush3.xpose.msk.msra.mxu1 %vm441_vm2, %v306_v57 }
 0x187   :  { %2192 = vmatpush3.xpose.msk.msra.mxu0 %vm441_vm2, %v308_v59  ;;  %2193 = vmatprep.mubr.msk.f32.mxu0 %vm2451_vm1, %v2450_v0 }
 0x188   :  { %v310_v63 = vpop.permute.xlu1 %309  ;;  %2201 = vmatprep.subr.mxu0 %v2450_v0  ;;  %2188 = vmatprep.mubr.msk.f32.mxu1 %vm2451_vm1, %v2450_v0 }
 0x189   :  { %v436_v1 = vpop.permute.xlu0 %435  ;;  %2196 = vmatprep.subr.mxu1 %v2450_v0 }
 0x18a   :  { %2194 = vmatmul.mubr.msk.f32.vlgmr.msra.gmra.mxu0 %vm441_vm2, %v436_v1 }
 0x18b   :  { %2203 = vmatprep.mubr.msk.f32.mxu0 %vm2451_vm1, %v2450_v0 }
 0x18c   :  { %v312_v2 = vpop.permute.xlu1 %311 }
 0x18d   :  { %v434_v3 = vpop.permute.xlu0 %433  ;;  %2202 = vmatpush3.xpose.msk.msra.mxu0 %vm441_vm2, %v312_v2 }
 0x18e   :  { %2189 = vmatmul.mubr.msk.f32.vlgmr.msra.gmra.mxu1 %vm441_vm2, %v434_v3  ;;  %2211 = vmatprep.subr.mxu0 %v2450_v0 }
 0x18f   :  { %2197 = vmatpush3.xpose.msk.msra.mxu1 %vm441_vm2, %v310_v63  ;;  %2198 = vmatprep.mubr.msk.f32.mxu1 %vm2451_vm1, %v2450_v0 }
 0x190   :  { %v440_v4 = vpop.permute.xlu1 %439  ;;  %2206 = vmatprep.subr.mxu1 %v2450_v0 }
 0x191   :  { %v438_v5 = vpop.permute.xlu0 %437  ;;  %2204 = vmatmul.mubr.msk.f32.vlgmr.msra.gmra.mxu0 %vm441_vm2, %v440_v4 }
 0x192   :  { %2199 = vmatmul.mubr.msk.f32.vlgmr.msra.gmra.mxu1 %vm441_vm2, %v438_v5  ;;  %2212 = vmatpush3.msra.mxu0 %v2574_v56 }
 0x193   :  { %2207 = vmatpush3.msra.mxu1 %v2572_v55  ;;  %2213 = vmatprep.mubr.msk.f32.mxu0 %vm2451_vm1, %v2450_v0 }
 0x194   :  { %2221 = vmatprep.subr.mxu0 %v2450_v0  ;;  %2208 = vmatprep.mubr.msk.f32.mxu1 %vm2451_vm1, %v2450_v0  ;;  %v316_v19 = vpop.permute.xlu1 %315 }
 0x195   :  { %2216 = vmatprep.subr.mxu1 %v2450_v0  ;;  %v318_v33 = vpop.permute.xlu0 %317 }
 0x198   :  { %v2624_v26 = vpop.permute.xlu1 %321 }
 0x19c   :  { %v324_v32 = vpop.permute.xlu1 %323 }
 0x1d1   :  { %v586_v6 = vpop.f32.mrf.mxu0 }
 0x1d2   :  { %v512_v7 = vpop.f32.mrf.mxu1  ;;  %v1037_v8 = vsel %vm441_vm2, %v586_v6, -inf }
 0x1d3   :  { %v2175_v9 = vpop.f32.mrf.mxu0  ;;  %1038 = vmax.xlane.f32.xlu1 %v1037_v8  ;;  %v1034_v10 = vsel %vm441_vm2, %v512_v7, -inf }
 0x1d4   :  { %1035 = vmax.xlane.f32.xlu0 %v1034_v10  ;;  %v2170_v11 = vpop.f32.mrf.mxu1  ;;  %v1706_v9 = vld [vmem:[#allocation10] sm:$0xff] }
 0x245   :  { %v660_v12 = vpop.f32.mrf.mxu1 }
 0x246   :  { %v734_v13 = vpop.f32.mrf.mxu0  ;;  %v1040_v18 = vsel %vm441_vm2, %v660_v12, -inf }
 0x247   :  { %v1043_v14 = vsel %vm441_vm2, %v734_v13, -inf  ;;  %v2180_v15 = vpop.f32.mrf.mxu1 }
 0x248   :  { %v2185_v16 = vpop.f32.mrf.mxu0  ;;  %1044 = vmax.xlane.f32.xlu0 %v1043_v14 }
 0x249   :  { %v1708_v16 = vld [vmem:[#allocation10 + $0x8] sm:$0xff] }
 0x24a   :  { %v882_v17 = vpop.f32.mrf.mxu0 }
 0x24b   :  { %v1049_v22 = vsel %vm441_vm2, %v882_v17, -inf }
 0x24c   :  { %v2195_v20 = vpop.f32.mrf.mxu0  ;;  %1041 = vmax.xlane.f32.xlu0 %v1040_v18 }
 0x24d   :  { %v1957_v20 = vld [vmem:[#allocation10 + $0x18] sm:$0xff] }
 0x24e   :  { %v808_v21 = vpop.f32.mrf.mxu1 }
 0x24f   :  { %v1046_v23 = vsel %vm441_vm2, %v808_v21, -inf }
 0x250   :  { %1050 = vmax.xlane.f32.xlu0 %v1049_v22  ;;  %1047 = vmax.xlane.f32.xlu1 %v1046_v23  ;;  %v2190_v24 = vpop.f32.mrf.mxu1 }
 0x251   :  { %v1030_v25 = vpop.f32.mrf.mxu0 }
 0x252   :  { %v956_v27 = vpop.f32.mrf.mxu1  ;;  %v1055_v28 = vsel %vm441_vm2, %v1030_v25, -inf }
 0x253   :  { %v2205_v29 = vpop.f32.mrf.mxu0  ;;  %v1052_v30 = vsel %vm441_vm2, %v956_v27, -inf }
 0x254   :  { %1056 = vmax.xlane.f32.xlu0 %v1055_v28  ;;  %1053 = vmax.xlane.f32.xlu1 %v1052_v30  ;;  %v2200_v31 = vpop.f32.mrf.mxu1 }
 0x25c   :  { %v1039_v34 = vpop.xlane.xlu1 %1038 }
 0x25d   :  { %v1059_v35 = vsub.f32 %v586_v6, %v1039_v34  ;;  %v1036_v36 = vpop.xlane.xlu0 %1035 }
 0x25e   :  { %v1058_v37 = vsub.f32 %v512_v7, %v1036_v36 }
 0x25f   :  { %v1068_v38 = vmul.f32 1.442695, %v1059_v35 }
 0x260   :  { %v1066_v39 = vmul.f32 1.442695, %v1058_v37 }
 0x261   :  { %2281 = vpow2.f32 %v1068_v38 }
 0x262   :  { %2283 = vpow2.f32 %v1066_v39 }
 0x265   :  { %329 = vrot.lane.b32.xlu1 %v2574_v56, %s2454_s3 }
 0x26a   :  { %327 = vrot.lane.b32.xlu0 %v2572_v55, %s2454_s3 }
 0x26e   :  { %v2282_v40 = vpop.eup %2281 }
 0x26f   :  { %v2284_v41 = vpop.eup %2283  ;;  %2214 = vmatmul.mubr.msk.f32.vlgmr.msra.gmra.mxu0 %vm441_vm2, %v2282_v40  ;;  %v1085_v42 = vsel %vm441_vm2, %v2282_v40, 0.0 }
 0x270   :  { %2222 = vmatpush3.msra.mxu0 %v318_v33  ;;  %2209 = vmatmul.mubr.msk.f32.vlgmr.msra.gmra.mxu1 %vm441_vm2, %v2284_v41  ;;  %v1082_v43 = vsel %vm441_vm2, %v2284_v41, 0.0 }
 0x271   :  { %2217 = vmatpush3.msra.mxu1 %v316_v19  ;;  %2223 = vmatprep.mubr.msk.f32.mxu0 %vm2451_vm1, %v2450_v0 }
 0x272   :  { %2231 = vmatprep.subr.mxu0 %v2450_v0  ;;  %2218 = vmatprep.mubr.msk.f32.mxu1 %vm2451_vm1, %v2450_v0 }
 0x273   :  { %2226 = vmatprep.subr.mxu1 %v2450_v0 }
 0x289   :  { %1086 = vadd.xlane.f32.xlu0 %v1085_v42 }
 0x28d   :  { %1083 = vadd.xlane.f32.xlu0 %v1082_v43 }
 0x2d1   :  { %v1045_v44 = vpop.xlane.xlu0 %1044 }
 0x2d2   :  { %v1061_v45 = vsub.f32 %v734_v13, %v1045_v44 }
 0x2d4   :  { %v1072_v46 = vmul.f32 1.442695, %v1061_v45 }
 0x2d5   :  { %v1042_v47 = vpop.xlane.xlu0 %1041 }
 0x2d6   :  { %2285 = vpow2.f32 %v1072_v46  ;;  %v1060_v48 = vsub.f32 %v660_v12, %v1042_v47 }
 0x2d8   :  { %v1070_v49 = vmul.f32 1.442695, %v1060_v48 }
 0x2d9   :  { %v1051_v50 = vpop.xlane.xlu0 %1050  ;;  %v1048_v51 = vpop.xlane.xlu1 %1047 }
 0x2da   :  { %2287 = vpow2.f32 %v1070_v49  ;;  %v1063_v52 = vsub.f32 %v882_v17, %v1051_v50  ;;  %v1062_v53 = vsub.f32 %v808_v21, %v1048_v51 }
 0x2dc   :  { %v1076_v54 = vmul.f32 1.442695, %v1063_v52  ;;  %v1074_v55 = vmul.f32 1.442695, %v1062_v53 }
 0x2dd   :  { %v1057_v56 = vpop.xlane.xlu0 %1056  ;;  %v1054_v57 = vpop.xlane.xlu1 %1053 }
 0x2de   :  { %2289 = vpow2.f32 %v1076_v54  ;;  %v1065_v58 = vsub.f32 %v1030_v25, %v1057_v56  ;;  %v1064_v59 = vsub.f32 %v956_v27, %v1054_v57 }
 0x2df   :  { %2291 = vpow2.f32 %v1074_v55 }
 0x2e0   :  { %v1080_v60 = vmul.f32 1.442695, %v1065_v58  ;;  %v1078_v61 = vmul.f32 1.442695, %v1064_v59 }
 0x2e1   :  { %v330_v5 = vpop.permute.xlu1 %329  ;;  %v328_v7 = vpop.permute.xlu0 %327 }
 0x2e2   :  { %2293 = vpow2.f32 %v1080_v60 }
 0x2e3   :  { %v2286_v62 = vpop.eup %2285  ;;  %2295 = vpow2.f32 %v1078_v61 }
 0x2e4   :  { %2224 = vmatmul.mubr.msk.f32.vlgmr.msra.gmra.mxu0 %vm441_vm2, %v2286_v62  ;;  %v1091_v63 = vsel %vm441_vm2, %v2286_v62, 0.0 }
 0x2e5   :  { %2232 = vmatpush3.msra.mxu0 %v324_v32  ;;  %1092 = vadd.xlane.f32.xlu1 %v1091_v63 }
 0x2e6   :  { %2233 = vmatprep.mubr.msk.f32.mxu0 %vm2451_vm1, %v2450_v0  ;;  %2241 = vmatprep.subr.mxu0 %v2450_v0 }
 0x2e7   :  { %v2288_v1 = vpop.eup %2287 }
 0x2e8   :  { %2219 = vmatmul.mubr.msk.f32.vlgmr.msra.gmra.mxu1 %vm441_vm2, %v2288_v1  ;;  %v1088_v2 = vsel %vm441_vm2, %v2288_v1, 0.0 }
 0x2e9   :  { %2227 = vmatpush3.msra.mxu1 %v2624_v26  ;;  %1089 = vadd.xlane.f32.xlu0 %v1088_v2 }
 0x2ea   :  { %2228 = vmatprep.mubr.msk.f32.mxu1 %vm2451_vm1, %v2450_v0  ;;  %2236 = vmatprep.subr.mxu1 %v2450_v0 }
 0x2eb   :  { %v2290_v3 = vpop.eup %2289 }
 0x2ec   :  { %v2292_v4 = vpop.eup %2291  ;;  %2234 = vmatmul.mubr.msk.f32.vlgmr.msra.gmra.mxu0 %vm441_vm2, %v2290_v3  ;;  %v1097_v6 = vsel %vm441_vm2, %v2290_v3, 0.0  ;;  %v2110_v3 = vld [vmem:[%s2689_s7] ss:$0 sm:$0xff] }
 0x2ed   :  { %2229 = vmatmul.mubr.msk.f32.vlgmr.msra.gmra.mxu1 %vm441_vm2, %v2292_v4  ;;  %2242 = vmatpush3.msra.mxu0 %v330_v5  ;;  %v1094_v8 = vsel %vm441_vm2, %v2292_v4, 0.0 }
 0x2ee   :  { %2237 = vmatpush3.msra.mxu1 %v328_v7  ;;  %1098 = vadd.xlane.f32.xlu0 %v1097_v6 }
 0x2ef   :  { %v2294_v10 = vpop.eup %2293  ;;  %1095 = vadd.xlane.f32.xlu1 %v1094_v8  ;;  %2238 = vmatprep.mubr.msk.f32.mxu1 %vm2451_vm1, %v2450_v0 }
 0x2f0   :  { %v2296_v11 = vpop.eup %2295  ;;  %2243 = vmatprep.mubr.msk.f32.mxu0 %vm2451_vm1, %v2450_v0  ;;  %v1103_v12 = vsel %vm441_vm2, %v2294_v10, 0.0  ;;  %2251 = vmatprep.subr.mxu0 %v1706_v9  ;;  %v1872_v0 = vld [vmem:[#allocation10 + $0x10] sm:$0xff] }
 0x2f1   :  { %2239 = vmatmul.mubr.msk.f32.vlgmr.msra.gmra.mxu1 %vm441_vm2, %v2296_v11  ;;  %2244 = vmatmul.mubr.msk.f32.vlgmr.msra.gmra.mxu0 %vm441_vm2, %v2294_v10  ;;  %v1100_v13 = vsel %vm441_vm2, %v2296_v11, 0.0 }
 0x2f2   :  { %1104 = vadd.xlane.f32.xlu0 %v1103_v12  ;;  %2252 = vmatpush3.msra.mxu0 %v1706_v9 }
 0x2f3   :  { %1101 = vadd.xlane.f32.xlu1 %v1100_v13  ;;  %2246 = vmatprep.subr.mxu1 %v1708_v16 }
 0x2f4   :  { %2247 = vmatpush3.msra.mxu1 %v1708_v16  ;;  %2261 = vmatprep.subr.mxu0 %v1957_v20 }
 0x2f5   :  { %2256 = vmatprep.subr.mxu1 %v1872_v0 }
 0x312   :  { %v1087_v14 = vpop.xlane.xlu0 %1086 }
 0x316   :  { %v1084_v15 = vpop.xlane.xlu0 %1083 }
 0x317   :  { %2297 = vrcp.f32 %v1084_v15 }
 0x318   :  { %2299 = vrcp.f32 %v1087_v14 }
 0x324   :  { %v2298_v18 = vpop.eup %2297 }
 0x325   :  { %v2300_v21 = vpop.eup %2299 }
 0x32f   :  { %v1248_v17 = vpop.f32.mrf.mxu0 }
 0x330   :  { %v1175_v19 = vpop.f32.mrf.mxu1  ;;  %v1693_v24 = vmul.f32 %v2300_v21, %v1248_v17 }
 0x331   :  { %v1691_v22 = vmul.f32 %v2298_v18, %v1175_v19  ;;  %v2215_v23 = vpop.f32.mrf.mxu0 }
 0x332   :  { %v2210_v25 = vpop.f32.mrf.mxu1 }
 0x333   :  { %2253 = vmatprep.mubr.msk.f32.mxu0 %vm441_vm2, %v1691_v22 }
 0x334   :  { %2254 = vmatmul.mubr.msk.f32.vlgmr.msra.gmra.mxu0 %vm441_vm2, %v1693_v24 }
 0x335   :  { %2262 = vmatpush3.msra.mxu0 %v1957_v20 }
 0x36e   :  { %v1093_v27 = vpop.xlane.xlu1 %1092 }
 0x372   :  { %v1090_v26 = vpop.xlane.xlu0 %1089 }
 0x373   :  { %2301 = vrcp.f32 %v1090_v26 }
 0x374   :  { %2303 = vrcp.f32 %v1093_v27 }
 0x377   :  { %v1099_v28 = vpop.xlane.xlu0 %1098 }
 0x378   :  { %v1096_v29 = vpop.xlane.xlu1 %1095  ;;  %2305 = vrcp.f32 %v1099_v28 }
 0x379   :  { %2307 = vrcp.f32 %v1096_v29 }
 0x37b   :  { %v1105_v30 = vpop.xlane.xlu0 %1104 }
 0x37c   :  { %v1102_v31 = vpop.xlane.xlu1 %1101  ;;  %2309 = vrcp.f32 %v1105_v30 }
 0x37d   :  { %2311 = vrcp.f32 %v1102_v31 }
 0x380   :  { %v2302_v34 = vpop.eup %2301 }
 0x381   :  { %v2304_v36 = vpop.eup %2303 }
 0x385   :  { %v2306_v40 = vpop.eup %2305 }
 0x386   :  { %v2308_v42 = vpop.eup %2307 }
 0x389   :  { %v2310_v48 = vpop.eup %2309 }
 0x38a   :  { %v2312_v49 = vpop.eup %2311 }
 0x3a4   :  { %v1394_v32 = vpop.f32.mrf.mxu0 }
 0x3a5   :  { %v1697_v38 = vmul.f32 %v2304_v36, %v1394_v32 }
 0x3a6   :  { %v2225_v33 = vpop.f32.mrf.mxu0 }
 0x3a8   :  { %v1321_v35 = vpop.f32.mrf.mxu1 }
 0x3a9   :  { %v1695_v37 = vmul.f32 %v2302_v34, %v1321_v35 }
 0x3aa   :  { %v2220_v39 = vpop.f32.mrf.mxu1 }
 0x3ab   :  { %2248 = vmatprep.mubr.msk.f32.mxu1 %vm441_vm2, %v1695_v37 }
 0x3ac   :  { %v1540_v41 = vpop.f32.mrf.mxu0  ;;  %2249 = vmatmul.mubr.msk.f32.vlgmr.msra.gmra.mxu1 %vm441_vm2, %v1697_v38 }
 0x3ad   :  { %v1467_v43 = vpop.f32.mrf.mxu1  ;;  %v1701_v44 = vmul.f32 %v2306_v40, %v1540_v41  ;;  %2257 = vmatpush3.msra.mxu1 %v1872_v0 }
 0x3ae   :  { %v1699_v45 = vmul.f32 %v2308_v42, %v1467_v43  ;;  %v2235_v46 = vpop.f32.mrf.mxu0 }
 0x3af   :  { %v2230_v47 = vpop.f32.mrf.mxu1 }
 0x3b0   :  { %2258 = vmatprep.mubr.msk.f32.mxu1 %vm441_vm2, %v1699_v45 }
 0x3b1   :  { %v1613_v50 = vpop.f32.mrf.mxu1  ;;  %v1686_v51 = vpop.f32.mrf.mxu0  ;;  %2259 = vmatmul.mubr.msk.f32.vlgmr.msra.gmra.mxu1 %vm441_vm2, %v1701_v44 }
 0x3b2   :  { %v1703_v52 = vmul.f32 %v2312_v49, %v1613_v50  ;;  %v1705_v53 = vmul.f32 %v2310_v48, %v1686_v51 }
 0x3b3   :  { %v2240_v54 = vpop.f32.mrf.mxu1  ;;  %v2245_v55 = vpop.f32.mrf.mxu0 }
 0x3b4   :  { %2263 = vmatprep.mubr.msk.f32.mxu0 %vm441_vm2, %v1703_v52 }
 0x3b5   :  { %2264 = vmatmul.mubr.msk.f32.vlgmr.msra.gmra.mxu0 %vm441_vm2, %v1705_v53 }
 0x3f4   :  { %v2255_v58 = vpop.f32.mrf.mxu0 }
 0x3f6   :  { %v1862_v61 = vpop.f32.mrf.mxu0 }
 0x46c   :  { %v2250_v56 = vpop.f32.mrf.mxu1 }
 0x46d   :  { %v1868_v60 = vadd.f32 %v2255_v58, %v2250_v56 }
 0x46e   :  { %v1781_v57 = vpop.f32.mrf.mxu1 }
 0x46f   :  { %v1863_v63 = vadd.f32 %v1862_v61, %v1781_v57 }
 0x471   :  { %v2260_v59 = vpop.f32.mrf.mxu1 }
 0x472   :  { %v1955_v1 = vadd.f32 %v2260_v59, %v1868_v60 }
 0x473   :  { %v1945_v62 = vpop.f32.mrf.mxu1 }
 0x474   :  { %v1954_v4 = vadd.f32 %v1945_v62, %v1863_v63 }
 0x475   :  { %v2265_v2 = vpop.f32.mrf.mxu0 }
 0x476   :  { %v2040_v5 = vadd.f32 %v2265_v2, %v1955_v1 }
 0x477   :  { %v2030_v6 = vpop.f32.mrf.mxu0 }
 0x478   :  { %v2049_v7 = vadd.f32 %v2110_v3, %v2040_v5  ;;  %v2039_v8 = vadd.f32 %v2030_v6, %v1954_v4 }
 0x47a   :  { %2051 = vst [vmem:[#allocation11 + $0x8] sm:$0xff] %v2049_v7  ;;  %v2048_v9 = vadd.f32 %v2110_v3, %v2039_v8 }
 0x47c   :  { %2050 = vst [vmem:[#allocation11] sm:$0xff] %v2048_v9 }
 0x47d   :  { %2424 = shalt.err (!%p2421_p1)
}
 0x47e   :  { %2063 = dma.vmem_to_hbm [thread:$0]  %s2058_s17, 256, %s2690_s8, [#allocation4], %s2443_s10, %s2443_s10, %s2444_s11  }
 0x47f   :  { %2439 = dma.done.wait [#allocation4], 256  }
 0x480   :  { %2440 = vsyncadd [#allocation4], 4294967040 }
 0x481   :  { %2067 = vsyncpa [#allocation3], 1 }
 0x482   :  { %2068 = vsyncpa [#allocation6], 1 }
 0x483   :  { %2069 = vsyncpa [#allocation9], 1 }
 0x484   :  { %2070 = vsyncpa [#allocation4], 1 }

</bundles_post_ra>
